<compile_context>
chip_gen: v7x
topology: tpu7x:2x2x1
jax: 0.10.0
libtpu: 0.0.40
codegen_flags: <defaults>
</compile_context>

<pallas_src>
import jax
import jax.numpy as jnp
from jax.experimental import pallas as pl
from jax.experimental.pallas import tpu as pltpu


def rnn_fc_kernel(x_ref,      # (B, T, I)  raw batch-first input
                  wih_ref,    # (I, H)     W_ih^T  (right-multiply form)
                  bias_ref,   # (1, H)     b_ih + b_hh (fused)
                  whh_ref,    # (H, H)     W_hh^T  (right-multiply form)
                  fc_ref,     # (H+1, O)   rows [0:H] = fc.weight^T, row H = fc.bias
                  out_ref):   # (B, O)
    B, T, I = x_ref.shape
    H = whh_ref.shape[0]

    # ---- Input projection (off the serial chain): one (B*T, I) @ (I, H) dot,
    # bias folded in here.  Done fully in-kernel -> no z_all HBM round trip.
    x_flat = x_ref[...].reshape(B * T, I)
    z_flat = jnp.dot(x_flat.astype(jnp.bfloat16),
                     wih_ref[...].astype(jnp.bfloat16),
                     preferred_element_type=jnp.float32) + bias_ref[...]
    z_all = z_flat.reshape(B, T, H)                       # (B, T, H) float32

    # Load + cast the recurrent weight once; reused by every unrolled step.
    whh_bf = whh_ref[...].astype(jnp.bfloat16)            # (H, H) bf16

    # h_0 = 0  =>  first step is just tanh of the projected input (no matmul).
    h = jnp.tanh(z_all[:, 0, :])                          # (B, H) float32

    # Fully unrolled recurrence (T small & static).  Only the single-pass bf16
    # h @ W_hh^T dot, the f32 add and the f32 tanh stay on the dependence chain.
    for t in range(1, T):
        hh = jnp.dot(h.astype(jnp.bfloat16), whh_bf,
                     preferred_element_type=jnp.float32)  # (B, H) f32 accumulate
        h = jnp.tanh(z_all[:, t, :] + hh)

    # ---- Final FC on the last hidden state (bias packed as extra weight row).
    fc_w = fc_ref[:H, :]                                  # (H, O)
    fc_b = fc_ref[H:H + 1, :]                             # (1, O)
    out_ref[...] = (jnp.dot(h.astype(jnp.bfloat16), fc_w.astype(jnp.bfloat16),
                            preferred_element_type=jnp.float32)
                    + fc_b)


def prepare_params(params):
    """One-time parameter prep (transposes / fusions) -- NOT per forward call."""
    H = params["w_hh"].shape[0]
    O = params["fc_w"].shape[0]
    return {
        "wih_t": params["w_ih"].T.astype(jnp.float32),                     # (I, H)
        "whh_t": params["w_hh"].T.astype(jnp.float32),                     # (H, H)
        "bias": (params["b_ih"] + params["b_hh"]).reshape(1, H)
                .astype(jnp.float32),                                      # (1, H)
        "fc_pack": jnp.concatenate(
            [params["fc_w"].T, params["fc_b"].reshape(1, O)],
            axis=0).astype(jnp.float32),                                   # (H+1, O)
    }


@jax.jit
def rnn_model_forward(x, prepped):
    """x: (B, T, I) float32, batch_first like the PyTorch module."""
    B, T, I = x.shape
    H = prepped["whh_t"].shape[0]
    O = prepped["fc_pack"].shape[1]

    # Advisory cost hint: tiny op; lets XLA pack surrounding ops tightly.
    flops = 2 * (B * T * I * H + (T - 1) * B * H * H + B * H * O)
    bytes_accessed = 4 * (B * T * I + I * H + H + H * H + (H + 1) * O + B * O)
    cost = pl.CostEstimate(flops=flops,
                           transcendentals=T * B * H,
                           bytes_accessed=bytes_accessed)

    # Everything (projection + recurrence + fc) in ONE grid-less pallas_call:
    # all operands are tiny whole-array VMEM residents; the recurrence is
    # serial in T and B=2/O=4 is far below a single vreg tile, so any grid or
    # multi-TC split would be pure launch/sync overhead.
    return pl.pallas_call(
        rnn_fc_kernel,
        out_shape=jax.ShapeDtypeStruct((B, O), jnp.float32),
        in_specs=[pl.BlockSpec(memory_space=pltpu.MemorySpace.VMEM)] * 5,
        out_specs=pl.BlockSpec(memory_space=pltpu.MemorySpace.VMEM),
        cost_estimate=cost,
    )(x, prepped["wih_t"], prepped["bias"], prepped["whh_t"], prepped["fc_pack"])


def rnn_model_reference(x, params):
    """Pure-JAX float32 reference of the same forward pass (for validation)."""
    B, T, I = x.shape
    H = params["w_hh"].shape[0]
    h = jnp.zeros((B, H), jnp.float32)
    for t in range(T):
        h = jnp.tanh(x[:, t, :] @ params["w_ih"].T
                     + h @ params["w_hh"].T
                     + params["b_ih"] + params["b_hh"])
    return h @ params["fc_w"].T + params["fc_b"]


def init_params(key, input_size=2, hidden_size=20, output_size=4):
    """Deterministic init mimicking PyTorch's U(-1/sqrt(H), 1/sqrt(H))."""
    k = 1.0 / jnp.sqrt(jnp.float32(hidden_size))
    keys = jax.random.split(key, 6)
    u = lambda kk, shape: jax.random.uniform(kk, shape, jnp.float32, -k, k)
    return {
        "w_ih": u(keys[0], (hidden_size, input_size)),
        "w_hh": u(keys[1], (hidden_size, hidden_size)),
        "b_ih": u(keys[2], (hidden_size,)),
        "b_hh": u(keys[3], (hidden_size,)),
        "fc_w": u(keys[4], (output_size, hidden_size)),
        "fc_b": u(keys[5], (output_size,)),
    }


if __name__ == "__main__":
    key = jax.random.PRNGKey(0)
    k_params, k_x = jax.random.split(key)

    B, T, I, H, O = 2, 8, 2, 20, 4
    params = init_params(k_params, input_size=I, hidden_size=H, output_size=O)
    prepped = prepare_params(params)          # one-time weight prep
    x = jax.random.normal(k_x, (B, T, I), jnp.float32)

    out = rnn_model_forward(x, prepped)
    out = jax.block_until_ready(out)

    ref = rnn_model_reference(x, params)
    assert out.shape == (B, O)
    # Tolerance reflects the intentional single-pass bf16 MXU operands inside
    # the kernel (f32 accumulation); expected deviation vs f32 reference ~1e-3.
    assert jnp.allclose(out, ref, atol=3e-2, rtol=3e-2), (out, ref)

    print("KERNEL_OK")
</pallas_src>

<mosaic_0001>
module attributes {stable_mosaic.version = 11 : i64} {
  func.func @rnn_fc_kernel(%arg0: memref<2x8x2xf32, #tpu.memory_space<vmem>>, %arg1: memref<2x20xf32, #tpu.memory_space<vmem>>, %arg2: memref<1x20xf32, #tpu.memory_space<vmem>>, %arg3: memref<20x20xf32, #tpu.memory_space<vmem>>, %arg4: memref<21x4xf32, #tpu.memory_space<vmem>>, %arg5: memref<2x4xf32, #tpu.memory_space<vmem>>) attributes {dimension_semantics = [], scalar_prefetch = 0 : i64, scratch_operands = 0 : i64, tpu.core_type = #tpu.core_type<tc>} {
    %c0 = arith.constant 0 : index
    %c0_0 = arith.constant 0 : index
    %c0_1 = arith.constant 0 : index
    %0 = vector.load %arg0[%c0, %c0_0, %c0_1] : memref<2x8x2xf32, #tpu.memory_space<vmem>>, vector<2x8x2xf32>
    %1 = vector.shape_cast %0 : vector<2x8x2xf32> to vector<16x2xf32>
    %2 = arith.truncf %1 : vector<16x2xf32> to vector<16x2xbf16>
    %c0_2 = arith.constant 0 : index
    %c0_3 = arith.constant 0 : index
    %3 = vector.load %arg1[%c0_2, %c0_3] : memref<2x20xf32, #tpu.memory_space<vmem>>, vector<2x20xf32>
    %4 = arith.truncf %3 : vector<2x20xf32> to vector<2x20xbf16>
    %cst = arith.constant dense<0.000000e+00> : vector<16x20xf32>
    %5 = tpu.matmul %2, %4, %cst {dimension_numbers = #tpu.dot_dimension_numbers<[1], [0], [0], [1], [0, 0, 1, 1], [], []>} : vector<16x2xbf16>, vector<2x20xbf16>, vector<16x20xf32> -> vector<16x20xf32>
    %c0_4 = arith.constant 0 : index
    %c0_5 = arith.constant 0 : index
    %6 = vector.load %arg2[%c0_4, %c0_5] : memref<1x20xf32, #tpu.memory_space<vmem>>, vector<1x20xf32>
    %7 = vector.broadcast %6 : vector<1x20xf32> to vector<16x20xf32>
    %8 = arith.addf %5, %7 : vector<16x20xf32>
    %9 = vector.shape_cast %8 : vector<16x20xf32> to vector<2x8x20xf32>
    %c0_6 = arith.constant 0 : index
    %c0_7 = arith.constant 0 : index
    %10 = vector.load %arg3[%c0_6, %c0_7] : memref<20x20xf32, #tpu.memory_space<vmem>>, vector<20x20xf32>
    %11 = arith.truncf %10 : vector<20x20xf32> to vector<20x20xbf16>
    %12 = vector.extract_strided_slice %9 {offsets = [0, 0, 0], sizes = [2, 1, 20], strides = [1, 1, 1]} : vector<2x8x20xf32> to vector<2x1x20xf32>
    %13 = vector.shape_cast %12 : vector<2x1x20xf32> to vector<2x20xf32>
    %14 = math.tanh %13 : vector<2x20xf32>
    %15 = arith.truncf %14 : vector<2x20xf32> to vector<2x20xbf16>
    %cst_8 = arith.constant dense<0.000000e+00> : vector<2x20xf32>
    %16 = tpu.matmul %15, %11, %cst_8 {dimension_numbers = #tpu.dot_dimension_numbers<[1], [0], [0], [1], [0, 0, 1, 1], [], []>} : vector<2x20xbf16>, vector<20x20xbf16>, vector<2x20xf32> -> vector<2x20xf32>
    %17 = vector.extract_strided_slice %9 {offsets = [0, 1, 0], sizes = [2, 1, 20], strides = [1, 1, 1]} : vector<2x8x20xf32> to vector<2x1x20xf32>
    %18 = vector.shape_cast %17 : vector<2x1x20xf32> to vector<2x20xf32>
    %19 = arith.addf %18, %16 : vector<2x20xf32>
    %20 = math.tanh %19 : vector<2x20xf32>
    %21 = arith.truncf %20 : vector<2x20xf32> to vector<2x20xbf16>
    %cst_9 = arith.constant dense<0.000000e+00> : vector<2x20xf32>
    %22 = tpu.matmul %21, %11, %cst_9 {dimension_numbers = #tpu.dot_dimension_numbers<[1], [0], [0], [1], [0, 0, 1, 1], [], []>} : vector<2x20xbf16>, vector<20x20xbf16>, vector<2x20xf32> -> vector<2x20xf32>
    %23 = vector.extract_strided_slice %9 {offsets = [0, 2, 0], sizes = [2, 1, 20], strides = [1, 1, 1]} : vector<2x8x20xf32> to vector<2x1x20xf32>
    %24 = vector.shape_cast %23 : vector<2x1x20xf32> to vector<2x20xf32>
    %25 = arith.addf %24, %22 : vector<2x20xf32>
    %26 = math.tanh %25 : vector<2x20xf32>
    %27 = arith.truncf %26 : vector<2x20xf32> to vector<2x20xbf16>
    %cst_10 = arith.constant dense<0.000000e+00> : vector<2x20xf32>
    %28 = tpu.matmul %27, %11, %cst_10 {dimension_numbers = #tpu.dot_dimension_numbers<[1], [0], [0], [1], [0, 0, 1, 1], [], []>} : vector<2x20xbf16>, vector<20x20xbf16>, vector<2x20xf32> -> vector<2x20xf32>
    %29 = vector.extract_strided_slice %9 {offsets = [0, 3, 0], sizes = [2, 1, 20], strides = [1, 1, 1]} : vector<2x8x20xf32> to vector<2x1x20xf32>
    %30 = vector.shape_cast %29 : vector<2x1x20xf32> to vector<2x20xf32>
    %31 = arith.addf %30, %28 : vector<2x20xf32>
    %32 = math.tanh %31 : vector<2x20xf32>
    %33 = arith.truncf %32 : vector<2x20xf32> to vector<2x20xbf16>
    %cst_11 = arith.constant dense<0.000000e+00> : vector<2x20xf32>
    %34 = tpu.matmul %33, %11, %cst_11 {dimension_numbers = #tpu.dot_dimension_numbers<[1], [0], [0], [1], [0, 0, 1, 1], [], []>} : vector<2x20xbf16>, vector<20x20xbf16>, vector<2x20xf32> -> vector<2x20xf32>
    %35 = vector.extract_strided_slice %9 {offsets = [0, 4, 0], sizes = [2, 1, 20], strides = [1, 1, 1]} : vector<2x8x20xf32> to vector<2x1x20xf32>
    %36 = vector.shape_cast %35 : vector<2x1x20xf32> to vector<2x20xf32>
    %37 = arith.addf %36, %34 : vector<2x20xf32>
    %38 = math.tanh %37 : vector<2x20xf32>
    %39 = arith.truncf %38 : vector<2x20xf32> to vector<2x20xbf16>
    %cst_12 = arith.constant dense<0.000000e+00> : vector<2x20xf32>
    %40 = tpu.matmul %39, %11, %cst_12 {dimension_numbers = #tpu.dot_dimension_numbers<[1], [0], [0], [1], [0, 0, 1, 1], [], []>} : vector<2x20xbf16>, vector<20x20xbf16>, vector<2x20xf32> -> vector<2x20xf32>
    %41 = vector.extract_strided_slice %9 {offsets = [0, 5, 0], sizes = [2, 1, 20], strides = [1, 1, 1]} : vector<2x8x20xf32> to vector<2x1x20xf32>
    %42 = vector.shape_cast %41 : vector<2x1x20xf32> to vector<2x20xf32>
    %43 = arith.addf %42, %40 : vector<2x20xf32>
    %44 = math.tanh %43 : vector<2x20xf32>
    %45 = arith.truncf %44 : vector<2x20xf32> to vector<2x20xbf16>
    %cst_13 = arith.constant dense<0.000000e+00> : vector<2x20xf32>
    %46 = tpu.matmul %45, %11, %cst_13 {dimension_numbers = #tpu.dot_dimension_numbers<[1], [0], [0], [1], [0, 0, 1, 1], [], []>} : vector<2x20xbf16>, vector<20x20xbf16>, vector<2x20xf32> -> vector<2x20xf32>
    %47 = vector.extract_strided_slice %9 {offsets = [0, 6, 0], sizes = [2, 1, 20], strides = [1, 1, 1]} : vector<2x8x20xf32> to vector<2x1x20xf32>
    %48 = vector.shape_cast %47 : vector<2x1x20xf32> to vector<2x20xf32>
    %49 = arith.addf %48, %46 : vector<2x20xf32>
    %50 = math.tanh %49 : vector<2x20xf32>
    %51 = arith.truncf %50 : vector<2x20xf32> to vector<2x20xbf16>
    %cst_14 = arith.constant dense<0.000000e+00> : vector<2x20xf32>
    %52 = tpu.matmul %51, %11, %cst_14 {dimension_numbers = #tpu.dot_dimension_numbers<[1], [0], [0], [1], [0, 0, 1, 1], [], []>} : vector<2x20xbf16>, vector<20x20xbf16>, vector<2x20xf32> -> vector<2x20xf32>
    %53 = vector.extract_strided_slice %9 {offsets = [0, 7, 0], sizes = [2, 1, 20], strides = [1, 1, 1]} : vector<2x8x20xf32> to vector<2x1x20xf32>
    %54 = vector.shape_cast %53 : vector<2x1x20xf32> to vector<2x20xf32>
    %55 = arith.addf %54, %52 : vector<2x20xf32>
    %56 = math.tanh %55 : vector<2x20xf32>
    %c0_15 = arith.constant 0 : index
    %c0_16 = arith.constant 0 : index
    %57 = vector.load %arg4[%c0_15, %c0_16] : memref<21x4xf32, #tpu.memory_space<vmem>>, vector<20x4xf32>
    %c20 = arith.constant 20 : index
    %c0_17 = arith.constant 0 : index
    %58 = vector.load %arg4[%c20, %c0_17] : memref<21x4xf32, #tpu.memory_space<vmem>>, vector<1x4xf32>
    %59 = arith.truncf %56 : vector<2x20xf32> to vector<2x20xbf16>
    %60 = arith.truncf %57 : vector<20x4xf32> to vector<20x4xbf16>
    %cst_18 = arith.constant dense<0.000000e+00> : vector<2x4xf32>
    %61 = tpu.matmul %59, %60, %cst_18 {dimension_numbers = #tpu.dot_dimension_numbers<[1], [0], [0], [1], [0, 0, 1, 1], [], []>} : vector<2x20xbf16>, vector<20x4xbf16>, vector<2x4xf32> -> vector<2x4xf32>
    %62 = vector.broadcast %58 : vector<1x4xf32> to vector<2x4xf32>
    %63 = arith.addf %61, %62 : vector<2x4xf32>
    %c0_19 = arith.constant 0 : index
    %c0_20 = arith.constant 0 : index
    %64 = vector.load %arg5[%c0_19, %c0_20] : memref<2x4xf32, #tpu.memory_space<vmem>>, vector<2x4xf32>
    tpu.vector_store %arg5[%c0_19, %c0_20], %63 {strides = array<i32>} : memref<2x4xf32, #tpu.memory_space<vmem>>, vector<2x4xf32>,
    return
  }
}

</mosaic_0001>

<bundles_post_ra>
// kernel: rnn_model_forward.1
= control target key start
LH: loop header
LB: loop body
LE: loop exit
PB: predicated region body
PF: predicated region fallthrough
CT: control target
= control target key end

     0   :  { %vm38_vm0 = vcmask 1040384   ;;  %v775_v2 = vmov 0.0   ;;  %vm776_vm1 = vmmov 0   ;;  %s944_s0 = inlined_call_operand.vmem [shape: f32[2,8,2], index: 0, kind: input, shape index: {}]   ;;  %s945_s1 = inlined_call_operand.vmem [shape: f32[2,20], index: 1, kind: input, shape index: {}]   ;;  %s946_s2 = inlined_call_operand.vmem [shape: f32[1,20], index: 2, kind: input, shape index: {}]   ;;  %s947_s3 = inlined_call_operand.vmem [shape: f32[20,20], index: 3, kind: input, shape index: {}]   ;;  %s948_s4 = inlined_call_operand.vmem [shape: f32[21,4], index: 4, kind: input, shape index: {}]   ;;  %s949_s5 = inlined_call_operand.hbm [shape: f32[2,4], index: 5, kind: output, shape index: {}]  }
   0x1   :  { %v25_v0 = vld [vmem:[%s945_s1] sm:$0x3]  ;;  %646 = vmatprep.subr.bf16.mxu0 %v775_v2  ;;  %648 = vmatprep.mubr.msk.bf16.mxu0 %vm776_vm1, %v775_v2  ;;  %v23_v4 = vld [vmem:[%s944_s0 + $0x8] sm:$0xff] }
   0x2   :  { %v22_v1 = vld [vmem:[%s944_s0] sm:$0xff]  ;;  %v26_v3 = vpack.c.bf16 %v25_v0, %v25_v0 }
   0x3   :  { %10 = vsyncpa [#allocation3], 0  ;;  %652 = vmatprep.subr.bf16.mxu1 %v775_v2  ;;  %656 = vmatprep.mubr.msk.bf16.mxu1 %vm776_vm1, %v775_v2  ;;  %v24_v6 = vpack.c.bf16 %v23_v4, %v22_v1  ;;  %vm34_vm2 = vcmask 15360   ;;  %v83_v7 = vld [vmem:[%s947_s3] sm:$0xff]  ;;  %v84_v8 = vld [vmem:[%s947_s3 + $0x8] sm:$0xff]  ;;  %vm104_vm3 = vcmask 1041408  }
   0x4   :  { %v40_v5 = vsel %vm38_vm0, %v26_v3, 0  ;;  %v85_v9 = vld [vmem:[%s947_s3 + $0x10] sm:$0xf]  ;;  %v835_v10 = vpack.c.bf16 %v84_v8, %v83_v7  ;;  %v609_v13 = vld [vmem:[%s946_s2] ss:$0 sm:$0xff]  ;;  %vm97_vm4 = vcmask 1041409  }
   0x5   :  { %647 = vmatpush3.bf16.msra.mxu0 %v40_v5  ;;  %v87_v11 = vpack.c.bf16 %v85_v9, %v85_v9  ;;  %vm100_vm5 = vcmask 162816   ;;  %s777_s11 = smov [#allocation2]   ;;  %vm593_vm6 = vcmask 25600  }
   0x6   :  { %660 = vmatprep.subr.bf16.mxu0 %v775_v2  ;;  %653 = vmatpush3.bf16.msra.mxu1 %v835_v10  ;;  %s601_s12 = sshll.u32 %s777_s11, 4  ;;  %s602_s12 = int_to_ptr.vmem [resolvable:$true] %s601_s12 }
   0x7   :  { %654 = vmatprep.subr.bf16.mxu1 %v775_v2  ;;  %v841_v12 = vsel %vm104_vm3, %v87_v11, 0  ;;  %s751_s13 = scalar_lea.vmem %s602_s12, 32  ;;  %p756_p1 = scmp.lt.s32.totalorder %s602_s12, %s602_s12 }
   0x8   :  { %649 = vmatmul.mubr.msk.bf16.vlgmr.msra.gmra.mrb[0].mxu0 %vm34_vm2, %v24_v6  ;;  %p752_p0 = scmp.ne.s32.totalorder %s602_s12, %s751_s13  ;;  %p757_p2 = scmp.lt.s32.totalorder %s751_s13, %s751_s13 }
   0x9   :  { %664 = vmatprep.mubr.msk.bf16.mxu0 %vm776_vm1, %v775_v2  ;;  %661 = vmatpush3.bf16.msra.mxu0 %v835_v10 }
   0xa   :  { %662 = vmatprep.subr.bf16.mxu0 %v775_v2  ;;  %655 = vmatpush3.bf16.msra.mxu1 %v841_v12  ;;  %p758_p3 = por %p757_p2, %p756_p1 }
   0xb   :  { %668 = vmatprep.subr.bf16.mxu1 %v775_v2 }
   0xc   :  { %p759_p4 = pnand %p758_p3, %p752_p0 }
   0xd   :  { %663 = vmatpush3.bf16.msra.mxu0 %v841_v12 }
   0xe   :  { %676 = vmatprep.subr.bf16.mxu0 %v775_v2 }
  0xdb   :  { %v76_v14 = vpop.f32.mrb[0].mxu0 }
  0xdc   :  { %v851_v15 = vadd.f32 %v609_v13, %v76_v14  ;;  %v650_v16 = vpop.f32.mrb[1].mxu0 }
  0xdd   :  { %v79_v17 = vpop.f32.mrb[2].mxu0 }
  0xde   :  { %v853_v18 = vadd.f32 %v609_v13, %v79_v17  ;;  %v651_v19 = vpop.f32.mrb[3].mxu0  ;;  %719 = vtanh.f32 %v851_v15 }
  0xe0   :  { %721 = vtanh.f32 %v853_v18 }
  0xe8   :  { %v720_v20 = vpop.eup %719 }
  0xe9   :  { %v90_v22 = vpack.c.bf16 %v720_v20, %v720_v20 }
  0xea   :  { %v722_v21 = vpop.eup %721 }
  0xeb   :  { %v91_v23 = vpack.c.bf16 %v722_v21, %v722_v21  ;;  %v94_v25 = vunpack.c.l.b16 %v90_v22 }
  0xed   :  { %v95_v24 = vunpack.c.l.b16 %v91_v23 }
  0xef   :  { %v96_v26 = vrot.slane %v95_v24, 7 }
  0xf1   :  { %v98_v27 = vsel %vm97_vm4, %v96_v26, %v94_v25 }
  0xf2   :  { %v99_v28 = vpack.c.b16 %v98_v27, %v98_v27 }
  0xf4   :  { %657 = vmatmul.mubr.msk.bf16.vlgmr.msra.gmra.mrb[0].mxu1 %vm100_vm5, %v99_v28 }
  0xf5   :  { %669 = vmatpush3.bf16.msra.mxu1 %v835_v10  ;;  %672 = vmatprep.mubr.msk.bf16.mxu1 %vm776_vm1, %v775_v2 }
  0xf6   :  { %670 = vmatprep.subr.bf16.mxu1 %v775_v2 }
  0xf9   :  { %671 = vmatpush3.bf16.msra.mxu1 %v841_v12 }
  0xfa   :  { %684 = vmatprep.subr.bf16.mxu1 %v775_v2 }
 0x1c7   :  { %v142_v29 = vpop.f32.mrb[0].mxu1 }
 0x1c8   :  { %v149_v30 = vrot.slane %v142_v29, 7  ;;  %v153_v31 = vadd.f32 %v142_v29, %v853_v18  ;;  %v658_v32 = vpop.f32.mrb[1].mxu1 }
 0x1c9   :  { %v145_v33 = vpop.f32.mrb[2].mxu1 }
 0x1ca   :  { %v152_v34 = vadd.f32 %v149_v30, %v851_v15  ;;  %723 = vtanh.f32 %v153_v31  ;;  %v659_v35 = vpop.f32.mrb[3].mxu1 }
 0x1cc   :  { %725 = vtanh.f32 %v152_v34 }
 0x1d4   :  { %v724_v36 = vpop.eup %723 }
 0x1d5   :  { %v157_v39 = vpack.c.bf16 %v724_v36, %v724_v36 }
 0x1d6   :  { %v726_v37 = vpop.eup %725 }
 0x1d7   :  { %v156_v38 = vpack.c.bf16 %v726_v37, %v726_v37  ;;  %v161_v41 = vunpack.c.l.b16 %v157_v39 }
 0x1d9   :  { %v160_v40 = vunpack.c.l.b16 %v156_v38 }
 0x1db   :  { %v162_v42 = vrot.slane %v160_v40, 1 }
 0x1dd   :  { %v163_v43 = vsel %vm97_vm4, %v161_v41, %v162_v42 }
 0x1de   :  { %v164_v44 = vpack.c.b16 %v163_v43, %v163_v43 }
 0x1e0   :  { %665 = vmatmul.mubr.msk.bf16.vlgmr.msra.gmra.mrb[4].mxu0 %vm100_vm5, %v164_v44 }
 0x1e1   :  { %677 = vmatpush3.bf16.msra.mxu0 %v835_v10  ;;  %680 = vmatprep.mubr.msk.bf16.mxu0 %vm776_vm1, %v775_v2 }
 0x1e2   :  { %678 = vmatprep.subr.bf16.mxu0 %v775_v2 }
 0x1e5   :  { %679 = vmatpush3.bf16.msra.mxu0 %v841_v12 }
 0x1e6   :  { %692 = vmatprep.subr.bf16.mxu0 %v775_v2 }
 0x2b3   :  { %v202_v45 = vpop.f32.mrb[4].mxu0 }
 0x2b4   :  { %v209_v46 = vrot.slane %v202_v45, 6  ;;  %v210_v47 = vrot.slane %v202_v45, 7  ;;  %v666_v48 = vpop.f32.mrb[5].mxu0 }
 0x2b5   :  { %v205_v49 = vpop.f32.mrb[6].mxu0 }
 0x2b6   :  { %v213_v50 = vadd.f32 %v209_v46, %v851_v15  ;;  %v214_v51 = vadd.f32 %v210_v47, %v853_v18  ;;  %v667_v52 = vpop.f32.mrb[7].mxu0 }
 0x2b8   :  { %727 = vtanh.f32 %v213_v50 }
 0x2b9   :  { %729 = vtanh.f32 %v214_v51 }
 0x2c2   :  { %v728_v53 = vpop.eup %727 }
 0x2c3   :  { %v730_v54 = vpop.eup %729  ;;  %v217_v55 = vpack.c.bf16 %v728_v53, %v728_v53 }
 0x2c4   :  { %v218_v56 = vpack.c.bf16 %v730_v54, %v730_v54 }
 0x2c5   :  { %v221_v57 = vunpack.c.l.b16 %v217_v55 }
 0x2c6   :  { %v222_v58 = vunpack.c.l.b16 %v218_v56 }
 0x2c7   :  { %v223_v59 = vrot.slane %v221_v57, 2 }
 0x2c8   :  { %v224_v60 = vrot.slane %v222_v58, 1 }
 0x2ca   :  { %v225_v61 = vsel %vm97_vm4, %v224_v60, %v223_v59 }
 0x2cb   :  { %v226_v62 = vpack.c.b16 %v225_v61, %v225_v61 }
 0x2cd   :  { %673 = vmatmul.mubr.msk.bf16.vlgmr.msra.gmra.mrb[4].mxu1 %vm100_vm5, %v226_v62 }
 0x2ce   :  { %685 = vmatpush3.bf16.msra.mxu1 %v835_v10  ;;  %688 = vmatprep.mubr.msk.bf16.mxu1 %vm776_vm1, %v775_v2 }
 0x2cf   :  { %686 = vmatprep.subr.bf16.mxu1 %v775_v2 }
 0x2d2   :  { %687 = vmatpush3.bf16.msra.mxu1 %v841_v12 }
 0x2d3   :  { %700 = vmatprep.subr.bf16.mxu1 %v775_v2 }
 0x3a0   :  { %v264_v63 = vpop.f32.mrb[4].mxu1 }
 0x3a1   :  { %v271_v0 = vrot.slane %v264_v63, 5  ;;  %v272_v1 = vrot.slane %v264_v63, 6  ;;  %v674_v3 = vpop.f32.mrb[5].mxu1 }
 0x3a2   :  { %v267_v4 = vpop.f32.mrb[6].mxu1 }
 0x3a3   :  { %v275_v5 = vadd.f32 %v271_v0, %v851_v15  ;;  %v276_v6 = vadd.f32 %v272_v1, %v853_v18  ;;  %v675_v7 = vpop.f32.mrb[7].mxu1 }
 0x3a5   :  { %731 = vtanh.f32 %v275_v5 }
 0x3a6   :  { %733 = vtanh.f32 %v276_v6 }
 0x3af   :  { %v732_v8 = vpop.eup %731 }
 0x3b0   :  { %v734_v9 = vpop.eup %733  ;;  %v279_v11 = vpack.c.bf16 %v732_v8, %v732_v8 }
 0x3b1   :  { %v280_v13 = vpack.c.bf16 %v734_v9, %v734_v9 }
 0x3b2   :  { %v283_v14 = vunpack.c.l.b16 %v279_v11 }
 0x3b3   :  { %v284_v16 = vunpack.c.l.b16 %v280_v13  ;;  %v527_v13 = vld [vmem:[%s948_s4] sm:$0xff] }
 0x3b4   :  { %v285_v17 = vrot.slane %v283_v14, 3  ;;  %v528_v14 = vld [vmem:[%s948_s4 + $0x8] sm:$0xff] }
 0x3b5   :  { %v286_v19 = vrot.slane %v284_v16, 2  ;;  %v533_v16 = vpack.c.bf16 %v528_v14, %v527_v13 }
 0x3b7   :  { %v287_v20 = vsel %vm97_vm4, %v286_v19, %v285_v17  ;;  %v529_v17 = vld [vmem:[%s948_s4 + $0x10] sm:$0xf] }
 0x3b8   :  { %v288_v21 = vpack.c.b16 %v287_v20, %v287_v20  ;;  %v534_v19 = vpack.c.bf16 %v529_v17, %v529_v17 }
 0x3ba   :  { %681 = vmatmul.mubr.msk.bf16.vlgmr.msra.gmra.mrb[8].mxu0 %vm100_vm5, %v288_v21  ;;  %v551_v20 = vsel %vm104_vm3, %v534_v19, 0 }
 0x3bb   :  { %693 = vmatpush3.bf16.msra.mxu0 %v835_v10  ;;  %696 = vmatprep.mubr.msk.bf16.mxu0 %vm776_vm1, %v775_v2 }
 0x3bc   :  { %694 = vmatprep.subr.bf16.mxu0 %v775_v2 }
 0x3bf   :  { %695 = vmatpush3.bf16.msra.mxu0 %v841_v12 }
 0x3c0   :  { %708 = vmatprep.subr.bf16.mxu0 %v775_v2 }
 0x48d   :  { %v326_v22 = vpop.f32.mrb[8].mxu0 }
 0x48e   :  { %v333_v23 = vrot.slane %v326_v22, 4  ;;  %v334_v24 = vrot.slane %v326_v22, 5  ;;  %v682_v25 = vpop.f32.mrb[9].mxu0 }
 0x48f   :  { %v329_v26 = vpop.f32.mrb[10].mxu0 }
 0x490   :  { %v337_v27 = vadd.f32 %v333_v23, %v851_v15  ;;  %v338_v28 = vadd.f32 %v334_v24, %v853_v18  ;;  %v683_v29 = vpop.f32.mrb[11].mxu0 }
 0x492   :  { %735 = vtanh.f32 %v337_v27 }
 0x493   :  { %737 = vtanh.f32 %v338_v28 }
 0x49c   :  { %v736_v30 = vpop.eup %735 }
 0x49d   :  { %v738_v31 = vpop.eup %737  ;;  %v341_v32 = vpack.c.bf16 %v736_v30, %v736_v30 }
 0x49e   :  { %v342_v33 = vpack.c.bf16 %v738_v31, %v738_v31 }
 0x49f   :  { %v345_v34 = vunpack.c.l.b16 %v341_v32 }
 0x4a0   :  { %v346_v35 = vunpack.c.l.b16 %v342_v33 }
 0x4a1   :  { %v347_v36 = vrot.slane %v345_v34, 4 }
 0x4a2   :  { %v348_v37 = vrot.slane %v346_v35, 3 }
 0x4a4   :  { %v349_v38 = vsel %vm97_vm4, %v348_v37, %v347_v36 }
 0x4a5   :  { %v350_v39 = vpack.c.b16 %v349_v38, %v349_v38 }
 0x4a7   :  { %689 = vmatmul.mubr.msk.bf16.vlgmr.msra.gmra.mrb[8].mxu1 %vm100_vm5, %v350_v39 }
 0x4a8   :  { %701 = vmatpush3.bf16.msra.mxu1 %v835_v10  ;;  %704 = vmatprep.mubr.msk.bf16.mxu1 %vm776_vm1, %v775_v2 }
 0x4a9   :  { %702 = vmatprep.subr.bf16.mxu1 %v775_v2 }
 0x4ac   :  { %703 = vmatpush3.bf16.msra.mxu1 %v841_v12 }
 0x57a   :  { %v388_v40 = vpop.f32.mrb[8].mxu1 }
 0x57b   :  { %v395_v41 = vrot.slane %v388_v40, 3  ;;  %v396_v42 = vrot.slane %v388_v40, 4  ;;  %v690_v43 = vpop.f32.mrb[9].mxu1 }
 0x57c   :  { %v391_v44 = vpop.f32.mrb[10].mxu1 }
 0x57d   :  { %v399_v45 = vadd.f32 %v395_v41, %v851_v15  ;;  %v400_v46 = vadd.f32 %v396_v42, %v853_v18  ;;  %v691_v47 = vpop.f32.mrb[11].mxu1 }
 0x57f   :  { %739 = vtanh.f32 %v399_v45 }
 0x580   :  { %741 = vtanh.f32 %v400_v46 }
 0x589   :  { %v740_v10 = vpop.eup %739 }
 0x58a   :  { %v742_v48 = vpop.eup %741  ;;  %v403_v49 = vpack.c.bf16 %v740_v10, %v740_v10 }
 0x58b   :  { %v404_v50 = vpack.c.bf16 %v742_v48, %v742_v48 }
 0x58c   :  { %v407_v51 = vunpack.c.l.b16 %v403_v49 }
 0x58d   :  { %v408_v52 = vunpack.c.l.b16 %v404_v50 }
 0x58e   :  { %v409_v53 = vrot.slane %v407_v51, 5 }
 0x58f   :  { %v410_v12 = vrot.slane %v408_v52, 4 }
 0x591   :  { %v411_v54 = vsel %vm97_vm4, %v410_v12, %v409_v53 }
 0x592   :  { %v412_v55 = vpack.c.b16 %v411_v54, %v411_v54 }
 0x594   :  { %697 = vmatmul.mubr.msk.bf16.vlgmr.msra.gmra.mrb[12].mxu0 %vm100_vm5, %v412_v55 }
 0x595   :  { %712 = vmatprep.mubr.msk.bf16.mxu0 %vm776_vm1, %v775_v2  ;;  %709 = vmatpush3.bf16.msra.mxu0 %v533_v16 }
 0x596   :  { %710 = vmatprep.subr.bf16.mxu0 %v775_v2 }
 0x599   :  { %711 = vmatpush3.bf16.msra.mxu0 %v551_v20 }
 0x667   :  { %v450_v56 = vpop.f32.mrb[12].mxu0 }
 0x668   :  { %v457_v57 = vrot.slane %v450_v56, 2  ;;  %v458_v58 = vrot.slane %v450_v56, 3  ;;  %v698_v59 = vpop.f32.mrb[13].mxu0 }
 0x669   :  { %v453_v60 = vpop.f32.mrb[14].mxu0 }
 0x66a   :  { %v461_v61 = vadd.f32 %v457_v57, %v851_v15  ;;  %v462_v62 = vadd.f32 %v458_v58, %v853_v18  ;;  %v699_v63 = vpop.f32.mrb[15].mxu0 }
 0x66c   :  { %743 = vtanh.f32 %v461_v61 }
 0x66d   :  { %745 = vtanh.f32 %v462_v62 }
 0x676   :  { %v744_v0 = vpop.eup %743 }
 0x677   :  { %v746_v1 = vpop.eup %745  ;;  %v465_v3 = vpack.c.bf16 %v744_v0, %v744_v0 }
 0x678   :  { %v466_v4 = vpack.c.bf16 %v746_v1, %v746_v1 }
 0x679   :  { %v469_v5 = vunpack.c.l.b16 %v465_v3 }
 0x67a   :  { %v470_v6 = vunpack.c.l.b16 %v466_v4 }
 0x67b   :  { %v471_v7 = vrot.slane %v469_v5, 6 }
 0x67c   :  { %v472_v8 = vrot.slane %v470_v6, 5 }
 0x67e   :  { %v473_v9 = vsel %vm97_vm4, %v472_v8, %v471_v7 }
 0x67f   :  { %v474_v11 = vpack.c.b16 %v473_v9, %v473_v9 }
 0x681   :  { %705 = vmatmul.mubr.msk.bf16.vlgmr.msra.gmra.mrb[12].mxu1 %vm100_vm5, %v474_v11 }
 0x754   :  { %v512_v21 = vpop.f32.mrb[12].mxu1 }
 0x755   :  { %v519_v22 = vrot.slane %v512_v21, 1  ;;  %v520_v23 = vrot.slane %v512_v21, 2  ;;  %v706_v24 = vpop.f32.mrb[13].mxu1 }
 0x756   :  { %v515_v25 = vpop.f32.mrb[14].mxu1 }
 0x757   :  { %v523_v26 = vadd.f32 %v519_v22, %v851_v15  ;;  %v524_v27 = vadd.f32 %v520_v23, %v853_v18  ;;  %v707_v28 = vpop.f32.mrb[15].mxu1  ;;  %v618_v15 = vld [vmem:[%s948_s4 + $0x14] ss:$0 sm:$0xff] }
 0x759   :  { %747 = vtanh.f32 %v523_v26 }
 0x75a   :  { %749 = vtanh.f32 %v524_v27 }
 0x763   :  { %v748_v29 = vpop.eup %747 }
 0x764   :  { %v750_v30 = vpop.eup %749  ;;  %v531_v31 = vpack.c.bf16 %v748_v29, %v748_v29 }
 0x765   :  { %v532_v2 = vpack.c.bf16 %v750_v30, %v750_v30 }
 0x766   :  { %v541_v32 = vunpack.c.l.b16 %v531_v31 }
 0x767   :  { %v542_v33 = vunpack.c.l.b16 %v532_v2 }
 0x768   :  { %v543_v34 = vrot.slane %v541_v32, 7 }
 0x769   :  { %v544_v35 = vrot.slane %v542_v33, 6 }
 0x76b   :  { %v545_v36 = vsel %vm97_vm4, %v544_v35, %v543_v34 }
 0x76c   :  { %v546_v37 = vpack.c.b16 %v545_v36, %v545_v36 }
 0x76e   :  { %713 = vmatmul.mubr.msk.bf16.vlgmr.msra.gmra.mrb[16].mxu0 %vm100_vm5, %v546_v37 }
 0x841   :  { %v587_v18 = vpop.f32.mrb[16].mxu0 }
 0x842   :  { %v588_v38 = vadd.f32 %v618_v15, %v587_v18  ;;  %v714_v39 = vpop.f32.mrb[17].mxu0 }
 0x843   :  { %v590_v40 = vpop.f32.mrb[18].mxu0 }
 0x844   :  { %v715_v41 = vpop.f32.mrb[19].mxu0  ;;  %594 = vst.msk [vmem:[#allocation2] sm:$0x3] %vm593_vm6, %v588_v38 }
 0x845   :  { %762 = shalt.err (!%p759_p4)
}
 0x846   :  { %s763_s4 = scalar_lea.hbm %s949_s5, 32 }
 0x847   :  { %p764_p5 = scmp.ne.s32.totalorder %s949_s5, %s763_s4  ;;  %p767_p6 = scmp.lt.u32.totalorder %s763_s4, %s949_s5 }
 0x849   :  { %p769_p7 = pnand %p767_p6, %p764_p5 }
 0x84b   :  { %772 = shalt.err (!%p769_p7)
}
 0x84c   :  { %604 = dma.vmem_to_hbm [thread:$0]  %s602_s12, 32, %s949_s5, [#allocation3]  }
 0x84d   :  { %773 = dma.done.wait [#allocation3], 32  }
 0x84e   :  { %774 = vsyncadd [#allocation3], 4294967264 }
 0x84f   :  { %608 = vsyncpa [#allocation3], 1 }

</bundles_post_ra>
